<compile_context>
chip_gen: v7x
topology: tpu7x:2x2x1
jax: 0.10.0
libtpu: 0.0.40
codegen_flags: <defaults>
</compile_context>

<pallas_src>
import functools
import math

import jax
import jax.numpy as jnp
from jax.experimental import pallas as pl
from jax.experimental.pallas import tpu as pltpu

HIDDEN = 16  # fixed by the PyTorch module (fc1 -> 16 -> fc2)
_INV_SQRT2 = 1.0 / math.sqrt(2.0)


def _mlp_kernel(x_ref, w1_ref, w2_ref, o_ref):
    # fc1 (packed): (bp, k*fin) @ (k*fin, k*16) -> (bp, k*16), f32 accumulation.
    h = jnp.dot(x_ref[...], w1_ref[...], preferred_element_type=jnp.float32)
    # Exact GELU (erf-based), matching nn.GELU() default.
    g = 0.5 * h * (1.0 + jax.lax.erf(h * _INV_SQRT2))
    # fc2 (packed): (bp, k*16) @ (k*16, k*fout) -> (bp, k*fout).
    y = jnp.dot(g.astype(w2_ref.dtype), w2_ref[...],
                preferred_element_type=jnp.float32)
    o_ref[...] = y.astype(o_ref.dtype)


def _round_up(a, b):
    return (a + b - 1) // b * b


def _block_diag(w, k):
    """Block-diagonal of k copies of w (keeps packed rows independent)."""
    if k == 1:
        return w
    r, c = w.shape
    out = jnp.zeros((k * r, k * c), w.dtype)
    for m in range(k):
        out = out.at[m * r:(m + 1) * r, m * c:(m + 1) * c].set(w)
    return out


@functools.partial(jax.jit, static_argnames=("block_rows",))
def mlp_forward(x, w1_t, w2_t, *, block_rows=512):
    """x: (B, fin); w1_t: (fin, 16); w2_t: (16, fout) — weights pre-transposed."""
    B, fin = x.shape
    fin2, hidden = w1_t.shape
    hidden2, fout = w2_t.shape
    assert fin2 == fin and hidden2 == hidden == HIDDEN

    # Lane-packing factor: pack k logical rows per 128-lane physical row so the
    # kernel's input/output last dim is a multiple of 128 (lane-dense stores).
    if fout < 128 and 128 % fout == 0:
        k = 128 // fout
    else:
        k = 1

    row_quantum = 8 * k                                # packed sublanes % 8 == 0
    br = max(row_quantum, _round_up(block_rows, row_quantum))
    br = min(br, _round_up(B, row_quantum))            # don't over-pad tiny batches
    B_pad = _round_up(B, br)

    # Zero-pad the batch; padded rows produce zeros and are sliced off below.
    if B_pad != B:
        x = jnp.pad(x, ((0, B_pad - B), (0, 0)))

    # Packed operands: row-major reshape is free; block-diagonal weights make
    # the packed matmuls exactly equivalent to the original per-row math.
    xp = x.reshape(B_pad // k, k * fin)
    w1p = _block_diag(w1_t, k)                         # (k*fin, k*hidden)
    w2p = _block_diag(w2_t, k)                         # (k*hidden, k*fout)

    bp = br // k                                       # packed rows per tile
    grid = (B_pad // br,)

    # VMEM budget: double-buffered x / out tiles + (double-buffered) weights.
    itemsize = jnp.dtype(x.dtype).itemsize
    tile_bytes = itemsize * (2 * bp * k * fin + 2 * bp * k * fout
                             + 2 * (k * fin) * (k * hidden)
                             + 2 * (k * hidden) * (k * fout))
    vmem_limit = int(min(64 * 1024 * 1024, max(16 * 1024 * 1024, 4 * tile_bytes)))

    cost = pl.CostEstimate(
        flops=2 * B * fin * hidden + 2 * B * hidden * fout,
        transcendentals=B * hidden,
        bytes_accessed=itemsize * (B * (fin + fout) + fin * hidden + hidden * fout),
    )

    out_p = pl.pallas_call(
        _mlp_kernel,
        out_shape=jax.ShapeDtypeStruct((B_pad // k, k * fout), x.dtype),
        grid=grid,
        in_specs=[
            pl.BlockSpec((bp, k * fin), lambda i: (i, 0)),
            pl.BlockSpec((k * fin, k * hidden), lambda i: (0, 0)),   # resident
            pl.BlockSpec((k * hidden, k * fout), lambda i: (0, 0)),  # resident
        ],
        out_specs=pl.BlockSpec((bp, k * fout), lambda i: (i, 0)),
        compiler_params=pltpu.CompilerParams(
            dimension_semantics=("parallel",),
            vmem_limit_bytes=vmem_limit,
        ),
        cost_estimate=cost,
    )(xp, w1p, w2p)

    return out_p.reshape(B_pad, fout)[:B]


def make_mlp_params(features_in, features_out, value, dtype=jnp.float32):
    # Matches the PyTorch module init:
    #   fc1.weight.fill_(value)     -> (16, features_in)
    #   fc2.weight.fill_(value * 2) -> (features_out, 16)
    # Stored transposed (in, out) so the kernel computes plain x @ W.
    w1_t = jnp.full((features_in, HIDDEN), value, dtype=dtype)
    w2_t = jnp.full((HIDDEN, features_out), value * 2, dtype=dtype)
    return w1_t, w2_t


def _reference(x, w1_t, w2_t):
    h = x @ w1_t
    g = jax.nn.gelu(h, approximate=False)
    return g @ w2_t


if __name__ == "__main__":
    features_in, features_out, value = 32, 32, 0.01
    key = jax.random.PRNGKey(0)
    k_small, k_big = jax.random.split(key)

    w1_t, w2_t = make_mlp_params(features_in, features_out, value)

    # Small shape consistent with the module's usage.
    B = 8
    x = jax.random.normal(k_small, (B, features_in), dtype=jnp.float32)
    out = jax.block_until_ready(mlp_forward(x, w1_t, w2_t))
    ref = _reference(x, w1_t, w2_t)
    assert out.shape == (B, features_out)
    assert jnp.allclose(out, ref, atol=1e-5, rtol=1e-5), "mismatch vs reference (B=8)"

    # Exercise batch padding + multi-tile grid (B not a multiple of the tile).
    B2 = 200
    x2 = jax.random.normal(k_big, (B2, features_in), dtype=jnp.float32)
    out2 = jax.block_until_ready(mlp_forward(x2, w1_t, w2_t, block_rows=64))
    ref2 = _reference(x2, w1_t, w2_t)
    assert out2.shape == (B2, features_out)
    assert jnp.allclose(out2, ref2, atol=1e-5, rtol=1e-5), "mismatch vs reference (B=200)"

    print("KERNEL_OK")
</pallas_src>

<mosaic_0001>
module attributes {stable_mosaic.version = 11 : i64} {
  func.func @_mlp_kernel(%arg0: i32, %arg1: memref<8x128xf32, #tpu.memory_space<vmem>>, %arg2: memref<128x64xf32, #tpu.memory_space<vmem>>, %arg3: memref<64x128xf32, #tpu.memory_space<vmem>>, %arg4: memref<8x128xf32, #tpu.memory_space<vmem>>) attributes {dimension_semantics = [#tpu.dimension_semantics<parallel>], iteration_bounds = array<i64: 1>, scalar_prefetch = 0 : i64, scratch_operands = 0 : i64, tpu.core_type = #tpu.core_type<tc>, window_params = [{transform_indices = @transform_0, window_bounds = array<i64: 8, 128>}, {pipeline_mode = #tpu.pipeline_mode<synchronous>, transform_indices = @transform_1, window_bounds = array<i64: 128, 64>}, {pipeline_mode = #tpu.pipeline_mode<synchronous>, transform_indices = @transform_2, window_bounds = array<i64: 64, 128>}, {transform_indices = @transform_3, window_bounds = array<i64: 8, 128>}]} {
    %c0 = arith.constant 0 : index
    %c0_0 = arith.constant 0 : index
    %0 = vector.load %arg1[%c0, %c0_0] : memref<8x128xf32, #tpu.memory_space<vmem>>, vector<8x128xf32>
    %c0_1 = arith.constant 0 : index
    %c0_2 = arith.constant 0 : index
    %1 = vector.load %arg2[%c0_1, %c0_2] : memref<128x64xf32, #tpu.memory_space<vmem>>, vector<128x64xf32>
    %cst = arith.constant dense<0.000000e+00> : vector<8x64xf32>
    %2 = tpu.matmul %0, %1, %cst {dimension_numbers = #tpu.dot_dimension_numbers<[1], [0], [0], [1], [0, 0, 1, 1], [], []>} : vector<8x128xf32>, vector<128x64xf32>, vector<8x64xf32> -> vector<8x64xf32>
    %cst_3 = arith.constant 5.000000e-01 : f32
    %3 = vector.broadcast %cst_3 : f32 to vector<8x64xf32>
    %4 = arith.mulf %3, %2 : vector<8x64xf32>
    %cst_4 = arith.constant 0.707106769 : f32
    %5 = vector.broadcast %cst_4 : f32 to vector<8x64xf32>
    %6 = arith.mulf %2, %5 : vector<8x64xf32>
    %7 = math.erf %6 : vector<8x64xf32>
    %cst_5 = arith.constant 1.000000e+00 : f32
    %8 = vector.broadcast %cst_5 : f32 to vector<8x64xf32>
    %9 = arith.addf %8, %7 : vector<8x64xf32>
    %10 = arith.mulf %4, %9 : vector<8x64xf32>
    %c0_6 = arith.constant 0 : index
    %c0_7 = arith.constant 0 : index
    %11 = vector.load %arg3[%c0_6, %c0_7] : memref<64x128xf32, #tpu.memory_space<vmem>>, vector<64x128xf32>
    %cst_8 = arith.constant dense<0.000000e+00> : vector<8x128xf32>
    %12 = tpu.matmul %10, %11, %cst_8 {dimension_numbers = #tpu.dot_dimension_numbers<[1], [0], [0], [1], [0, 0, 1, 1], [], []>} : vector<8x64xf32>, vector<64x128xf32>, vector<8x128xf32> -> vector<8x128xf32>
    %c0_9 = arith.constant 0 : index
    %c0_10 = arith.constant 0 : index
    %13 = vector.load %arg4[%c0_9, %c0_10] : memref<8x128xf32, #tpu.memory_space<vmem>>, vector<8x128xf32>
    tpu.vector_store %arg4[%c0_9, %c0_10], %12 {strides = array<i32>} : memref<8x128xf32, #tpu.memory_space<vmem>>, vector<8x128xf32>,
    return
  }
  func.func @transform_0(%arg0: i32) -> (i32, i32) {
    %c0_i32 = arith.constant 0 : i32
    %c0_i32_0 = arith.constant 0 : i32
    return %arg0, %c0_i32 : i32, i32
  }
  func.func @transform_1(%arg0: i32) -> (i32, i32) {
    %c0_i32 = arith.constant 0 : i32
    %c0_i32_0 = arith.constant 0 : i32
    %c0_i32_1 = arith.constant 0 : i32
    return %c0_i32, %c0_i32_0 : i32, i32
  }
  func.func @transform_2(%arg0: i32) -> (i32, i32) {
    %c0_i32 = arith.constant 0 : i32
    %c0_i32_0 = arith.constant 0 : i32
    %c0_i32_1 = arith.constant 0 : i32
    return %c0_i32, %c0_i32_0 : i32, i32
  }
  func.func @transform_3(%arg0: i32) -> (i32, i32) {
    %c0_i32 = arith.constant 0 : i32
    %c0_i32_0 = arith.constant 0 : i32
    return %arg0, %c0_i32 : i32, i32
  }
}

</mosaic_0001>

<bundles_post_ra>
// kernel: mlp_forward.1
= control target key start
LH: loop header
LB: loop body
LE: loop exit
PB: predicated region body
PF: predicated region fallthrough
CT: control target
= control target key end

     0   :  { %v315_v0 = vmov 0.0|0.0   ;;  %vm316_vm0 = vmmov 0   ;;  %v317_v4 = vmov 0.0   ;;  %vm114_vm1 = vcmask 523264   ;;  %s428_s1 = inlined_call_operand.vmem [shape: f32[128,64], index: 1, kind: input, shape index: {}]   ;;  %s429_s0 = inlined_call_operand.vmem [shape: f32[8,128], index: 0, kind: input, shape index: {}]   ;;  %s430_s2 = inlined_call_operand.vmem [shape: f32[64,128], index: 2, kind: input, shape index: {}]   ;;  %s431_s3 = inlined_call_operand.vmem [shape: f32[8,128], index: 3, kind: output, shape index: {}]  }
   0x1   :  { %274 = vmatprep.subr.bf16.mxu0 %v315_v0  ;;  %v15_v1 = vld [vmem:[%s428_s1] sm:$0xff]  ;;  %v16_v2 = vld [vmem:[%s428_s1 + $0x8] sm:$0xff]  ;;  %v17_v3 = vld [vmem:[%s428_s1 + $0x10] sm:$0xff]  ;;  %252 = vmatprep.mubr.msk.f32.mxu0 %vm316_vm0, %v317_v4 }
   0x2   :  { %v275_v5 = vpack.c.bf16 %v16_v2, %v15_v1  ;;  %v18_v6 = vld [vmem:[%s428_s1 + $0x18] sm:$0xff]  ;;  %298 = vmatprep.subr.bf16.mxu1 %v315_v0  ;;  %271 = vmatprep.mubr.msk.f32.mxu1 %vm316_vm0, %v317_v4  ;;  %v19_v8 = vld [vmem:[%s428_s1 + $0x20] sm:$0xff]  ;;  %v20_v9 = vld [vmem:[%s428_s1 + $0x28] sm:$0xff] }
   0x3   :  { %v278_v7 = vpack.c.bf16 %v18_v6, %v17_v3  ;;  %v281_v10 = vpack.c.bf16 %v20_v9, %v19_v8  ;;  %v21_v11 = vld [vmem:[%s428_s1 + $0x30] sm:$0xff]  ;;  %v22_v12 = vld [vmem:[%s428_s1 + $0x38] sm:$0xff]  ;;  %v23_v14 = vld [vmem:[%s428_s1 + $0x40] sm:$0xff] }
   0x4   :  { %276 = vmatpush3.bf16.msra.mxu0 %v275_v5  ;;  %v284_v13 = vpack.c.bf16 %v22_v12, %v21_v11  ;;  %v24_v15 = vld [vmem:[%s428_s1 + $0x48] sm:$0xff]  ;;  %v25_v17 = vld [vmem:[%s428_s1 + $0x50] sm:$0xff]  ;;  %v26_v18 = vld [vmem:[%s428_s1 + $0x58] sm:$0xff] }
   0x5   :  { %277 = vmatprep.subr.bf16.mxu0 %v315_v0  ;;  %v287_v16 = vpack.c.bf16 %v24_v15, %v23_v14  ;;  %v290_v19 = vpack.c.bf16 %v26_v18, %v25_v17  ;;  %v27_v20 = vld [vmem:[%s428_s1 + $0x60] sm:$0xff]  ;;  %v28_v21 = vld [vmem:[%s428_s1 + $0x68] sm:$0xff]  ;;  %v29_v23 = vld [vmem:[%s428_s1 + $0x70] sm:$0xff] }
   0x6   :  { %v293_v22 = vpack.c.bf16 %v28_v21, %v27_v20  ;;  %v30_v24 = vld [vmem:[%s428_s1 + $0x78] sm:$0xff]  ;;  %v14_v26 = vld [vmem:[%s429_s0] sm:$0xff]  ;;  %v107_v28 = vld [vmem:[%s430_s2 + $0x8] sm:$0xff] }
   0x7   :  { %v296_v25 = vpack.c.bf16 %v30_v24, %v29_v23  ;;  %v106_v27 = vld [vmem:[%s430_s2] sm:$0xff]  ;;  %v108_v30 = vld [vmem:[%s430_s2 + $0x10] sm:$0xff]  ;;  %v109_v31 = vld [vmem:[%s430_s2 + $0x18] sm:$0xff] }
   0x8   :  { %279 = vmatpush3.bf16.msra.mxu0 %v278_v7  ;;  %v299_v29 = vpack.c.bf16 %v107_v28, %v106_v27  ;;  %v302_v32 = vpack.c.bf16 %v109_v31, %v108_v30  ;;  %v110_v33 = vld [vmem:[%s430_s2 + $0x20] sm:$0xff]  ;;  %v111_v34 = vld [vmem:[%s430_s2 + $0x28] sm:$0xff]  ;;  %v112_v36 = vld [vmem:[%s430_s2 + $0x30] sm:$0xff] }
   0x9   :  { %280 = vmatprep.subr.bf16.mxu0 %v315_v0  ;;  %v305_v35 = vpack.c.bf16 %v111_v34, %v110_v33  ;;  %v113_v37 = vld [vmem:[%s430_s2 + $0x38] sm:$0xff] }
   0xa   :  { %300 = vmatpush3.bf16.msra.mxu1 %v299_v29  ;;  %v308_v38 = vpack.c.bf16 %v113_v37, %v112_v36 }
   0xb   :  { %301 = vmatprep.subr.bf16.mxu1 %v315_v0 }
   0xc   :  { %282 = vmatpush3.bf16.msra.mxu0 %v281_v10 }
   0xd   :  { %283 = vmatprep.subr.bf16.mxu0 %v315_v0 }
   0xe   :  { %303 = vmatpush3.bf16.msra.mxu1 %v302_v32 }
   0xf   :  { %304 = vmatprep.subr.bf16.mxu1 %v315_v0 }
  0x10   :  { %285 = vmatpush3.bf16.msra.mxu0 %v284_v13 }
  0x11   :  { %286 = vmatprep.subr.bf16.mxu0 %v315_v0 }
  0x12   :  { %306 = vmatpush3.bf16.msra.mxu1 %v305_v35 }
  0x13   :  { %307 = vmatprep.subr.bf16.mxu1 %v315_v0 }
  0x14   :  { %288 = vmatpush3.bf16.msra.mxu0 %v287_v16 }
  0x15   :  { %289 = vmatprep.subr.bf16.mxu0 %v315_v0 }
  0x16   :  { %309 = vmatpush3.bf16.msra.mxu1 %v308_v38 }
  0x18   :  { %291 = vmatpush3.bf16.msra.mxu0 %v290_v19 }
  0x19   :  { %292 = vmatprep.subr.bf16.mxu0 %v315_v0 }
  0x1c   :  { %294 = vmatpush3.bf16.msra.mxu0 %v293_v22 }
  0x1d   :  { %295 = vmatprep.subr.bf16.mxu0 %v315_v0 }
  0x20   :  { %297 = vmatpush3.bf16.msra.mxu0 %v296_v25 }
  0x23   :  { %253 = vmatmul.mubr.f32.vlgmr.msra.gmra.mrb[0].mxu0 %v14_v26 }
  0xf6   :  { %v97_v39 = vpop.f32.mrb[0].mxu0 }
  0xf7   :  { %v102_v40 = vmul.f32 0.70710677, %v97_v39  ;;  %v254_v41 = vpop.f32.mrb[1].mxu0  ;;  %v101_v43 = vmul.f32 0.5, %v97_v39 }
  0xf9   :  { %313 = verf.f32 %v102_v40 }
 0x103   :  { %v314_v42 = vpop.eup %313 }
 0x104   :  { %v104_v44 = vadd.f32 1.0, %v314_v42 }
 0x106   :  { %v105_v45 = vmul.f32 %v104_v44, %v101_v43 }
 0x108   :  { %272 = vmatmul.mubr.msk.f32.vlgmr.msra.gmra.mrb[0].mxu1 %vm114_vm1, %v105_v45 }
 0x1db   :  { %v184_v46 = vpop.f32.mrb[0].mxu1 }
 0x1dc   :  { %188 = vst [vmem:[%s431_s3] sm:$0xff] %v184_v46  ;;  %v273_v47 = vpop.f32.mrb[1].mxu1 }

</bundles_post_ra>
